<compile_context>
chip_gen: v7x
topology: tpu7x:2x2x1
jax: 0.10.0
libtpu: 0.0.40
codegen_flags: <defaults>
</compile_context>

<pallas_src>
import math

import jax
import jax.numpy as jnp
from jax.experimental import pallas as pl
from jax.experimental.pallas import tpu as pltpu


# --------------------------------------------------------------------------- #
# Kernels
# --------------------------------------------------------------------------- #
def _ffn_kernel_resident(x_ref, w1_ref, b1_ref, w2_ref, b2_ref, o_ref):
    # x_ref:  (TM, d)      activation row tile (f32)
    # w1_ref: (d, 4d)      bf16 W1 (fully resident)
    # b1_ref: (1, 4d)      f32 b1
    # w2_ref: (4d, d)      bf16 W2 (fully resident)
    # b2_ref: (1, d)       f32 b2
    # o_ref:  (TM, d)      output row tile
    x = x_ref[...].astype(jnp.bfloat16)
    h = jnp.dot(x, w1_ref[...], preferred_element_type=jnp.float32)
    h = jnp.maximum(h + b1_ref[...], 0.0)
    y = jnp.dot(h.astype(jnp.bfloat16), w2_ref[...],
                preferred_element_type=jnp.float32)
    o_ref[...] = (y + b2_ref[...]).astype(o_ref.dtype)


def _ffn_kernel_slab(x_ref, w1_ref, b1_ref, w2_ref, b2_ref, o_ref, acc_ref):
    # Hidden dim tiled into slabs of TH; acc_ref accumulates Linear2 over slabs.
    h_idx = pl.program_id(1)

    @pl.when(h_idx == 0)
    def _():
        acc_ref[...] = jnp.zeros_like(acc_ref)

    x = x_ref[...].astype(jnp.bfloat16)
    h = jnp.dot(x, w1_ref[...], preferred_element_type=jnp.float32)
    h = jnp.maximum(h + b1_ref[...], 0.0)
    acc_ref[...] += jnp.dot(h.astype(jnp.bfloat16), w2_ref[...],
                            preferred_element_type=jnp.float32)

    @pl.when(h_idx == pl.num_programs(1) - 1)
    def _():
        o_ref[...] = (acc_ref[...] + b2_ref[...]).astype(o_ref.dtype)


# --------------------------------------------------------------------------- #
# Tiling / call builders
# --------------------------------------------------------------------------- #
def _pick_hidden_tile(hidden, d, weight_vmem_budget):
    """Hidden-dim tile: full (weights resident) if they fit, else a 128-aligned slab."""
    if 2 * (d * hidden + hidden * d) <= weight_vmem_budget:  # bf16 bytes
        return hidden
    # Double-buffered bf16 slabs of W1[:, th] and W2[th, :] must fit the budget.
    max_th = max(128, weight_vmem_budget // (8 * d))
    th = (max_th // 128) * 128
    while th >= 128:
        if hidden % th == 0:
            return th
        th -= 128
    # TODO(synk): hidden has no 128-aligned divisor within budget; fall back to resident.
    return hidden


def _build_resident_call(m, d, hidden, tm, out_dtype, single_buffer_weights):
    def _wspec(shape):
        if single_buffer_weights:
            # Constant index_map -> fetched once; no need to double-buffer.
            return pl.BlockSpec(shape, lambda i: (0, 0),
                                pipeline_mode=pl.Buffered(1))
        return pl.BlockSpec(shape, lambda i: (0, 0))

    out_bytes = jnp.dtype(out_dtype).itemsize
    w_bufs = 1 if single_buffer_weights else 2
    est = (2 * tm * d * 4                      # x tile, double-buffered
           + 2 * tm * d * out_bytes            # out tile, double-buffered
           + w_bufs * 2 * d * hidden * 2       # W1 + W2 (bf16)
           + w_bufs * (hidden + d) * 4)        # biases (f32)
    vmem_limit = int(min(64 << 20, max(32 << 20, est * 3 // 2 + (2 << 20))))

    grid_spec = pltpu.PrefetchScalarGridSpec(
        num_scalar_prefetch=0,
        grid=(pl.cdiv(m, tm),),
        in_specs=[
            pl.BlockSpec((tm, d), lambda i: (i, 0)),   # x row tile
            _wspec((d, hidden)),                       # W1
            _wspec((1, hidden)),                       # b1
            _wspec((hidden, d)),                       # W2
            _wspec((1, d)),                            # b2
        ],
        out_specs=pl.BlockSpec((tm, d), lambda i: (i, 0)),
        scratch_shapes=[],
    )
    return pl.pallas_call(
        _ffn_kernel_resident,
        out_shape=jax.ShapeDtypeStruct((m, d), out_dtype),
        grid_spec=grid_spec,
        compiler_params=pltpu.CompilerParams(
            dimension_semantics=("parallel",),
            vmem_limit_bytes=vmem_limit,
        ),
    )


def _build_slab_call(m, d, hidden, tm, th, out_dtype):
    n_h = hidden // th
    out_bytes = jnp.dtype(out_dtype).itemsize
    est = (2 * tm * d * 4                 # x tile, double-buffered
           + 2 * tm * d * out_bytes       # out tile, double-buffered
           + tm * d * 4                   # f32 accumulator scratch
           + 2 * 2 * d * th * 2           # W1 + W2 slabs (bf16), double-buffered
           + 2 * (th + d) * 4)            # biases
    vmem_limit = int(min(64 << 20, max(32 << 20, est * 3 // 2 + (2 << 20))))

    grid_spec = pltpu.PrefetchScalarGridSpec(
        num_scalar_prefetch=0,
        grid=(pl.cdiv(m, tm), n_h),                       # hidden (reduction) axis last
        in_specs=[
            pl.BlockSpec((tm, d), lambda i, h: (i, 0)),   # x row tile (constant over h)
            pl.BlockSpec((d, th), lambda i, h: (0, h)),   # W1 column slab
            pl.BlockSpec((1, th), lambda i, h: (0, h)),   # b1 slab
            pl.BlockSpec((th, d), lambda i, h: (h, 0)),   # W2 row slab
            pl.BlockSpec((1, d), lambda i, h: (0, 0)),    # b2
        ],
        out_specs=pl.BlockSpec((tm, d), lambda i, h: (i, 0)),
        scratch_shapes=[pltpu.VMEM((tm, d), jnp.float32)],
    )
    return pl.pallas_call(
        _ffn_kernel_slab,
        out_shape=jax.ShapeDtypeStruct((m, d), out_dtype),
        grid_spec=grid_spec,
        compiler_params=pltpu.CompilerParams(
            dimension_semantics=("parallel", "arbitrary"),
            vmem_limit_bytes=vmem_limit,
        ),
    )


# --------------------------------------------------------------------------- #
# Public wrapper
# --------------------------------------------------------------------------- #
def feed_forward(x, w1, b1, w2, b2, *, tm=256, weight_vmem_budget=32 * 1024 * 1024):
    """x: [..., d]; w1: [d, 4d]; b1: [4d]; w2: [4d, d]; b2: [d]. Returns [..., d]."""
    d = x.shape[-1]
    hidden = w1.shape[1]
    lead = x.shape[:-1]
    x2 = x.reshape(-1, d)
    m = x2.shape[0]

    # Large row tile for MXU shape; when m is small use the full row extent (no pad).
    tm_eff = tm if m >= tm else m
    th = _pick_hidden_tile(hidden, d, weight_vmem_budget)

    # bf16 MXU operands; in a real model these bf16 weight copies are made once.
    w1b = w1 if w1.dtype == jnp.bfloat16 else w1.astype(jnp.bfloat16)
    w2b = w2 if w2.dtype == jnp.bfloat16 else w2.astype(jnp.bfloat16)
    b1_2d = b1.reshape(1, hidden).astype(jnp.float32)
    b2_2d = b2.reshape(1, d).astype(jnp.float32)

    args = (x2, w1b, b1_2d, w2b, b2_2d)
    if th == hidden:
        try:
            out2d = _build_resident_call(m, d, hidden, tm_eff, x.dtype,
                                         single_buffer_weights=True)(*args)
        except Exception:
            # pl.Buffered(1) single-buffering unsupported on this jax/libtpu:
            # fall back to default double-buffered weights (correct, more VMEM).
            out2d = _build_resident_call(m, d, hidden, tm_eff, x.dtype,
                                         single_buffer_weights=False)(*args)
    else:
        out2d = _build_slab_call(m, d, hidden, tm_eff, th, x.dtype)(*args)

    return out2d.reshape(*lead, d)


# --------------------------------------------------------------------------- #
# Params / references / self-test
# --------------------------------------------------------------------------- #
def init_params(key, input_dim):
    """Deterministic init mirroring torch.nn.Linear defaults (uniform +/- 1/sqrt(fan_in))."""
    hidden = input_dim * 4
    k1, k2, k3, k4 = jax.random.split(key, 4)
    bound1 = 1.0 / math.sqrt(input_dim)
    bound2 = 1.0 / math.sqrt(hidden)
    # Stored as [in, out] so the kernel computes x @ W (== x @ W_torch.T).
    w1 = jax.random.uniform(k1, (input_dim, hidden), jnp.float32, -bound1, bound1)
    b1 = jax.random.uniform(k2, (hidden,), jnp.float32, -bound1, bound1)
    w2 = jax.random.uniform(k3, (hidden, input_dim), jnp.float32, -bound2, bound2)
    b2 = jax.random.uniform(k4, (input_dim,), jnp.float32, -bound2, bound2)
    return w1, b1, w2, b2


def feed_forward_ref_f32(x, w1, b1, w2, b2):
    h = jnp.maximum(x @ w1 + b1, 0.0)
    return h @ w2 + b2


def feed_forward_ref_bf16(x, w1, b1, w2, b2):
    # Numerics-matched reference: bf16 matmul operands, f32 accumulation / elementwise.
    h = jnp.dot(x.astype(jnp.bfloat16), w1.astype(jnp.bfloat16),
                preferred_element_type=jnp.float32) + b1
    h = jnp.maximum(h, 0.0)
    return jnp.dot(h.astype(jnp.bfloat16), w2.astype(jnp.bfloat16),
                   preferred_element_type=jnp.float32) + b2


if __name__ == "__main__":
    key = jax.random.PRNGKey(0)
    kx, kp = jax.random.split(key)

    # d multiple of 128 keeps the output stores lane-dense.
    batch, seq, input_dim = 2, 8, 128   # hidden = 512
    x = jax.random.normal(kx, (batch, seq, input_dim), jnp.float32)
    w1, b1, w2, b2 = init_params(kp, input_dim)

    ref32 = feed_forward_ref_f32(x, w1, b1, w2, b2)
    ref16 = feed_forward_ref_bf16(x, w1, b1, w2, b2)

    # Weights-resident path (single fused pass, 1-D grid).
    out = jax.block_until_ready(feed_forward(x, w1, b1, w2, b2))
    assert out.shape == (batch, seq, input_dim)
    assert jnp.allclose(out, ref16, atol=1e-3, rtol=1e-3), "mismatch vs bf16-matched ref"
    assert jnp.allclose(out, ref32, atol=5e-2, rtol=5e-2), "mismatch vs f32 ref"

    # Hidden-slab (accumulator) path, forced by a tiny weight-VMEM budget.
    out2 = jax.block_until_ready(
        feed_forward(x, w1, b1, w2, b2, weight_vmem_budget=64 * 1024))
    assert jnp.allclose(out2, ref16, atol=1e-3, rtol=1e-3), "mismatch vs bf16-matched ref (slab)"
    assert jnp.allclose(out2, ref32, atol=5e-2, rtol=5e-2), "mismatch vs f32 ref (slab)"

    print("KERNEL_OK")
</pallas_src>

<mosaic_0001>
module attributes {stable_mosaic.version = 11 : i64} {
  func.func @_ffn_kernel_resident(%arg0: i32, %arg1: memref<16x128xf32, #tpu.memory_space<vmem>>, %arg2: memref<128x512xbf16, #tpu.memory_space<vmem>>, %arg3: memref<1x512xf32, #tpu.memory_space<vmem>>, %arg4: memref<512x128xbf16, #tpu.memory_space<vmem>>, %arg5: memref<1x128xf32, #tpu.memory_space<vmem>>, %arg6: memref<16x128xf32, #tpu.memory_space<vmem>>) attributes {dimension_semantics = [#tpu.dimension_semantics<parallel>], iteration_bounds = array<i64: 1>, scalar_prefetch = 0 : i64, scratch_operands = 0 : i64, tpu.core_type = #tpu.core_type<tc>, window_params = [{transform_indices = @transform_0, window_bounds = array<i64: 16, 128>}, {pipeline_mode = #tpu.pipeline_mode<synchronous>, transform_indices = @transform_1, window_bounds = array<i64: 128, 512>}, {pipeline_mode = #tpu.pipeline_mode<synchronous>, transform_indices = @transform_2, window_bounds = array<i64: 1, 512>}, {pipeline_mode = #tpu.pipeline_mode<synchronous>, transform_indices = @transform_3, window_bounds = array<i64: 512, 128>}, {pipeline_mode = #tpu.pipeline_mode<synchronous>, transform_indices = @transform_4, window_bounds = array<i64: 1, 128>}, {transform_indices = @transform_5, window_bounds = array<i64: 16, 128>}]} {
    %c0 = arith.constant 0 : index
    %c0_0 = arith.constant 0 : index
    %0 = vector.load %arg1[%c0, %c0_0] : memref<16x128xf32, #tpu.memory_space<vmem>>, vector<16x128xf32>
    %1 = arith.truncf %0 : vector<16x128xf32> to vector<16x128xbf16>
    %c0_1 = arith.constant 0 : index
    %c0_2 = arith.constant 0 : index
    %2 = vector.load %arg2[%c0_1, %c0_2] : memref<128x512xbf16, #tpu.memory_space<vmem>>, vector<128x512xbf16>
    %cst = arith.constant dense<0.000000e+00> : vector<16x512xf32>
    %3 = tpu.matmul %1, %2, %cst {dimension_numbers = #tpu.dot_dimension_numbers<[1], [0], [0], [1], [0, 0, 1, 1], [], []>} : vector<16x128xbf16>, vector<128x512xbf16>, vector<16x512xf32> -> vector<16x512xf32>
    %c0_3 = arith.constant 0 : index
    %c0_4 = arith.constant 0 : index
    %4 = vector.load %arg3[%c0_3, %c0_4] : memref<1x512xf32, #tpu.memory_space<vmem>>, vector<1x512xf32>
    %5 = vector.broadcast %4 : vector<1x512xf32> to vector<16x512xf32>
    %6 = arith.addf %3, %5 : vector<16x512xf32>
    %cst_5 = arith.constant 0.000000e+00 : f32
    %7 = vector.broadcast %cst_5 : f32 to vector<16x512xf32>
    %8 = arith.maximumf %6, %7 : vector<16x512xf32>
    %9 = arith.truncf %8 : vector<16x512xf32> to vector<16x512xbf16>
    %c0_6 = arith.constant 0 : index
    %c0_7 = arith.constant 0 : index
    %10 = vector.load %arg4[%c0_6, %c0_7] : memref<512x128xbf16, #tpu.memory_space<vmem>>, vector<512x128xbf16>
    %cst_8 = arith.constant dense<0.000000e+00> : vector<16x128xf32>
    %11 = tpu.matmul %9, %10, %cst_8 {dimension_numbers = #tpu.dot_dimension_numbers<[1], [0], [0], [1], [0, 0, 1, 1], [], []>} : vector<16x512xbf16>, vector<512x128xbf16>, vector<16x128xf32> -> vector<16x128xf32>
    %c0_9 = arith.constant 0 : index
    %c0_10 = arith.constant 0 : index
    %12 = vector.load %arg5[%c0_9, %c0_10] : memref<1x128xf32, #tpu.memory_space<vmem>>, vector<1x128xf32>
    %13 = vector.broadcast %12 : vector<1x128xf32> to vector<16x128xf32>
    %14 = arith.addf %11, %13 : vector<16x128xf32>
    %c0_11 = arith.constant 0 : index
    %c0_12 = arith.constant 0 : index
    %15 = vector.load %arg6[%c0_11, %c0_12] : memref<16x128xf32, #tpu.memory_space<vmem>>, vector<16x128xf32>
    tpu.vector_store %arg6[%c0_11, %c0_12], %14 {strides = array<i32>} : memref<16x128xf32, #tpu.memory_space<vmem>>, vector<16x128xf32>,
    return
  }
  func.func @transform_0(%arg0: i32) -> (i32, i32) {
    %c0_i32 = arith.constant 0 : i32
    %c0_i32_0 = arith.constant 0 : i32
    return %arg0, %c0_i32 : i32, i32
  }
  func.func @transform_1(%arg0: i32) -> (i32, i32) {
    %c0_i32 = arith.constant 0 : i32
    %c0_i32_0 = arith.constant 0 : i32
    %c0_i32_1 = arith.constant 0 : i32
    return %c0_i32, %c0_i32_0 : i32, i32
  }
  func.func @transform_2(%arg0: i32) -> (i32, i32) {
    %c0_i32 = arith.constant 0 : i32
    %c0_i32_0 = arith.constant 0 : i32
    %c0_i32_1 = arith.constant 0 : i32
    return %c0_i32, %c0_i32_0 : i32, i32
  }
  func.func @transform_3(%arg0: i32) -> (i32, i32) {
    %c0_i32 = arith.constant 0 : i32
    %c0_i32_0 = arith.constant 0 : i32
    %c0_i32_1 = arith.constant 0 : i32
    return %c0_i32, %c0_i32_0 : i32, i32
  }
  func.func @transform_4(%arg0: i32) -> (i32, i32) {
    %c0_i32 = arith.constant 0 : i32
    %c0_i32_0 = arith.constant 0 : i32
    %c0_i32_1 = arith.constant 0 : i32
    return %c0_i32, %c0_i32_0 : i32, i32
  }
  func.func @transform_5(%arg0: i32) -> (i32, i32) {
    %c0_i32 = arith.constant 0 : i32
    %c0_i32_0 = arith.constant 0 : i32
    return %arg0, %c0_i32 : i32, i32
  }
}

module attributes {stable_mosaic.version = 11 : i64} {
  func.func @_ffn_kernel_resident(%arg0: i32, %arg1: memref<16x128xf32, #tpu.memory_space<vmem>>, %arg2: memref<128x512xbf16, #tpu.memory_space<vmem>>, %arg3: memref<1x512xf32, #tpu.memory_space<vmem>>, %arg4: memref<512x128xbf16, #tpu.memory_space<vmem>>, %arg5: memref<1x128xf32, #tpu.memory_space<vmem>>, %arg6: memref<16x128xf32, #tpu.memory_space<vmem>>) attributes {dimension_semantics = [#tpu.dimension_semantics<parallel>], iteration_bounds = array<i64: 1>, scalar_prefetch = 0 : i64, scratch_operands = 0 : i64, tpu.core_type = #tpu.core_type<tc>, window_params = [{transform_indices = @transform_0, window_bounds = array<i64: 16, 128>}, {pipeline_mode = #tpu.pipeline_mode<synchronous>, transform_indices = @transform_1, window_bounds = array<i64: 128, 512>}, {pipeline_mode = #tpu.pipeline_mode<synchronous>, transform_indices = @transform_2, window_bounds = array<i64: 1, 512>}, {pipeline_mode = #tpu.pipeline_mode<synchronous>, transform_indices = @transform_3, window_bounds = array<i64: 512, 128>}, {pipeline_mode = #tpu.pipeline_mode<synchronous>, transform_indices = @transform_4, window_bounds = array<i64: 1, 128>}, {transform_indices = @transform_5, window_bounds = array<i64: 16, 128>}]} {
    %c0 = arith.constant 0 : index
    %c0_0 = arith.constant 0 : index
    %0 = vector.load %arg1[%c0, %c0_0] : memref<16x128xf32, #tpu.memory_space<vmem>>, vector<16x128xf32>
    %1 = arith.truncf %0 : vector<16x128xf32> to vector<16x128xbf16>
    %c0_1 = arith.constant 0 : index
    %c0_2 = arith.constant 0 : index
    %2 = vector.load %arg2[%c0_1, %c0_2] : memref<128x512xbf16, #tpu.memory_space<vmem>>, vector<128x512xbf16>
    %cst = arith.constant dense<0.000000e+00> : vector<16x512xf32>
    %3 = tpu.matmul %1, %2, %cst {dimension_numbers = #tpu.dot_dimension_numbers<[1], [0], [0], [1], [0, 0, 1, 1], [], []>} : vector<16x128xbf16>, vector<128x512xbf16>, vector<16x512xf32> -> vector<16x512xf32>
    %c0_3 = arith.constant 0 : index
    %c0_4 = arith.constant 0 : index
    %4 = vector.load %arg3[%c0_3, %c0_4] : memref<1x512xf32, #tpu.memory_space<vmem>>, vector<1x512xf32>
    %5 = vector.broadcast %4 : vector<1x512xf32> to vector<16x512xf32>
    %6 = arith.addf %3, %5 : vector<16x512xf32>
    %cst_5 = arith.constant 0.000000e+00 : f32
    %7 = vector.broadcast %cst_5 : f32 to vector<16x512xf32>
    %8 = arith.maximumf %6, %7 : vector<16x512xf32>
    %9 = arith.truncf %8 : vector<16x512xf32> to vector<16x512xbf16>
    %c0_6 = arith.constant 0 : index
    %c0_7 = arith.constant 0 : index
    %10 = vector.load %arg4[%c0_6, %c0_7] : memref<512x128xbf16, #tpu.memory_space<vmem>>, vector<512x128xbf16>
    %cst_8 = arith.constant dense<0.000000e+00> : vector<16x128xf32>
    %11 = tpu.matmul %9, %10, %cst_8 {dimension_numbers = #tpu.dot_dimension_numbers<[1], [0], [0], [1], [0, 0, 1, 1], [], []>} : vector<16x512xbf16>, vector<512x128xbf16>, vector<16x128xf32> -> vector<16x128xf32>
    %c0_9 = arith.constant 0 : index
    %c0_10 = arith.constant 0 : index
    %12 = vector.load %arg5[%c0_9, %c0_10] : memref<1x128xf32, #tpu.memory_space<vmem>>, vector<1x128xf32>
    %13 = vector.broadcast %12 : vector<1x128xf32> to vector<16x128xf32>
    %14 = arith.addf %11, %13 : vector<16x128xf32>
    %c0_11 = arith.constant 0 : index
    %c0_12 = arith.constant 0 : index
    %15 = vector.load %arg6[%c0_11, %c0_12] : memref<16x128xf32, #tpu.memory_space<vmem>>, vector<16x128xf32>
    tpu.vector_store %arg6[%c0_11, %c0_12], %14 {strides = array<i32>} : memref<16x128xf32, #tpu.memory_space<vmem>>, vector<16x128xf32>,
    return
  }
  func.func @transform_0(%arg0: i32) -> (i32, i32) {
    %c0_i32 = arith.constant 0 : i32
    %c0_i32_0 = arith.constant 0 : i32
    return %arg0, %c0_i32 : i32, i32
  }
  func.func @transform_1(%arg0: i32) -> (i32, i32) {
    %c0_i32 = arith.constant 0 : i32
    %c0_i32_0 = arith.constant 0 : i32
    %c0_i32_1 = arith.constant 0 : i32
    return %c0_i32, %c0_i32_0 : i32, i32
  }
  func.func @transform_2(%arg0: i32) -> (i32, i32) {
    %c0_i32 = arith.constant 0 : i32
    %c0_i32_0 = arith.constant 0 : i32
    %c0_i32_1 = arith.constant 0 : i32
    return %c0_i32, %c0_i32_0 : i32, i32
  }
  func.func @transform_3(%arg0: i32) -> (i32, i32) {
    %c0_i32 = arith.constant 0 : i32
    %c0_i32_0 = arith.constant 0 : i32
    %c0_i32_1 = arith.constant 0 : i32
    return %c0_i32, %c0_i32_0 : i32, i32
  }
  func.func @transform_4(%arg0: i32) -> (i32, i32) {
    %c0_i32 = arith.constant 0 : i32
    %c0_i32_0 = arith.constant 0 : i32
    %c0_i32_1 = arith.constant 0 : i32
    return %c0_i32, %c0_i32_0 : i32, i32
  }
  func.func @transform_5(%arg0: i32) -> (i32, i32) {
    %c0_i32 = arith.constant 0 : i32
    %c0_i32_0 = arith.constant 0 : i32
    return %arg0, %c0_i32 : i32, i32
  }
}

</mosaic_0001>

<bundles_post_ra>
// kernel: tpu_custom_call.1
= control target key start
LH: loop header
LB: loop body
LE: loop exit
PB: predicated region body
PF: predicated region fallthrough
CT: control target
= control target key end

     0   :  { %10 = vsyncpa [#allocation3], 0  ;;  %s1138_s0 = inlined_call_operand.hbm [shape: f32[16,128], index: 0, kind: input, shape index: {}]   ;;  %s1139_s1 = inlined_call_operand.hbm [shape: bf16[128,512], index: 1, kind: input, shape index: {}]   ;;  %s1140_s2 = inlined_call_operand.vmem [shape: f32[1,512], index: 2, kind: input, shape index: {}]   ;;  %s1141_s3 = inlined_call_operand.hbm [shape: bf16[512,128], index: 3, kind: input, shape index: {}]   ;;  %s1142_s4 = inlined_call_operand.vmem [shape: f32[1,128], index: 4, kind: input, shape index: {}]   ;;  %s1143_s5 = inlined_call_operand.hbm [shape: f32[16,128], index: 5, kind: output, shape index: {}]  }
   0x1   :  { %11 = vsyncpa [#allocation6], 0 }
   0x2   :  { %12 = vsyncpa [#allocation4], 0  ;;  %s1037_s18 = smov [#allocation5]   ;;  %s943_s22 = scalar_lea.hbm %s1139_s1, 4096 }
   0x3   :  { %s30_s19 = sshll.u32 %s1037_s18, 4  ;;  %p944_p0 = scmp.ne.s32.totalorder %s1139_s1, %s943_s22  ;;  %s31_s19 = int_to_ptr.vmem [resolvable:$true] %s30_s19 }
   0x4   :  { %p947_p1 = scmp.lt.u32.totalorder %s943_s22, %s1139_s1 }
   0x6   :  { %p949_p2 = pnand %p947_p1, %p944_p0 }
   0x8   :  { %952 = shalt.err (!%p949_p2)
}
   0x9   :  { %s953_s27 = scalar_lea.vmem %s31_s19, 4096  ;;  %p958_p4 = scmp.lt.s32.totalorder %s31_s19, %s31_s19 }
   0xa   :  { %p954_p3 = scmp.ne.s32.totalorder %s31_s19, %s953_s27  ;;  %p959_p5 = scmp.lt.s32.totalorder %s953_s27, %s953_s27 }
   0xc   :  { %p960_p6 = por %p959_p5, %p958_p4 }
   0xe   :  { %p961_p7 = pnand %p960_p6, %p954_p3 }
  0x10   :  { %964 = shalt.err (!%p961_p7)
}
  0x11   :  { %s1038_s28 = smov 256   ;;  %s1039_s29 = smov 16  }
  0x12   :  { %36 = dma.hbm_to_vmem [thread:$0]  %s1139_s1, 4096, %s31_s19, [#allocation6], %s1038_s28, %s1038_s28, %s1039_s29  }
  0x13   :  { %s1040_s7 = smov [#allocation2]   ;;  %s965_s11 = scalar_lea.hbm %s1138_s0, 256 }
  0x14   :  { %s18_s8 = sshll.u32 %s1040_s7, 4  ;;  %p966_p8 = scmp.ne.s32.totalorder %s1138_s0, %s965_s11  ;;  %s19_s8 = int_to_ptr.vmem [resolvable:$true] %s18_s8 }
  0x15   :  { %p969_p9 = scmp.lt.u32.totalorder %s965_s11, %s1138_s0 }
  0x17   :  { %p971_p10 = pnand %p969_p9, %p966_p8 }
  0x19   :  { %974 = shalt.err (!%p971_p10)
}
  0x1a   :  { %s975_s16 = scalar_lea.vmem %s19_s8, 256  ;;  %p980_p12 = scmp.lt.s32.totalorder %s19_s8, %s19_s8 }
  0x1b   :  { %p976_p11 = scmp.ne.s32.totalorder %s19_s8, %s975_s16  ;;  %p981_p13 = scmp.lt.s32.totalorder %s975_s16, %s975_s16 }
  0x1d   :  { %p982_p0 = por %p981_p13, %p980_p12 }
  0x1f   :  { %p983_p1 = pnand %p982_p0, %p976_p11 }
  0x21   :  { %986 = shalt.err (!%p983_p1)
}
  0x22   :  { %s1041_s1 = smov 128   ;;  %s1042_s17 = smov 8  }
  0x23   :  { %24 = dma.hbm_to_vmem [thread:$0]  %s1138_s0, 256, %s19_s8, [#allocation3], %s1041_s1, %s1041_s1, %s1042_s17  }
  0x24   :  { %s1043_s20 = smov [#allocation7]   ;;  %s987_s24 = scalar_lea.hbm %s1141_s3, 4096 }
  0x25   :  { %s44_s21 = sshll.u32 %s1043_s20, 4  ;;  %p988_p2 = scmp.ne.s32.totalorder %s1141_s3, %s987_s24  ;;  %s45_s21 = int_to_ptr.vmem [resolvable:$true] %s44_s21 }
  0x26   :  { %p991_p3 = scmp.lt.u32.totalorder %s987_s24, %s1141_s3 }
  0x28   :  { %p993_p4 = pnand %p991_p3, %p988_p2 }
  0x2a   :  { %996 = shalt.err (!%p993_p4)
}
  0x2b   :  { %s997_s29 = scalar_lea.vmem %s45_s21, 4096  ;;  %p1002_p6 = scmp.lt.s32.totalorder %s45_s21, %s45_s21 }
  0x2c   :  { %p998_p5 = scmp.ne.s32.totalorder %s45_s21, %s997_s29  ;;  %p1003_p7 = scmp.lt.s32.totalorder %s997_s29, %s997_s29 }
  0x2e   :  { %p1004_p8 = por %p1003_p7, %p1002_p6 }
  0x30   :  { %p1005_p9 = pnand %p1004_p8, %p998_p5 }
  0x32   :  { %1008 = shalt.err (!%p1005_p9)
}
  0x33   :  { %s1044_s0 = smov 64   ;;  %s1045_s30 = smov 4  }
  0x34   :  { %50 = dma.hbm_to_vmem [thread:$0]  %s1141_s3, 4096, %s45_s21, [#allocation6], %s1044_s0, %s1044_s0, %s1045_s30  }
  0x35   :  { %1031 = dma.done.wait [#allocation3], 256  }
  0x36   :  { %1032 = vsyncadd [#allocation3], 4294967040 }
  0x37   :  { %1033 = dma.done.wait [#allocation6], 8192  }
  0x38   :  { %1034 = vsyncadd [#allocation6], 4294959104  ;;  %v1046_v0 = vmov 0   ;;  %v863_v1 = vld [vmem:[#allocation5 + $0x4] ss:$16 sps:$4 sm:$0xff]   ;;  %v64_v34 = vld [vmem:[#allocation2 + $0x8] sm:$0xff] }
  0x39   :  { %312 = vmatprep.mubr.bf16.mxu0 %v1046_v0  ;;  %355 = vmatprep.mubr.bf16.mxu1 %v1046_v0  ;;  %v865_v2 = vld [vmem:[#allocation5 + $0xc] ss:$16 sps:$4 sm:$0xff]   ;;  %v867_v3 = vld [vmem:[#allocation5] ss:$16 sps:$4 sm:$0xff]   ;;  %v868_v4 = vld [vmem:[#allocation5 + $0x8] ss:$16 sps:$4 sm:$0xff]  }
  0x3a   :  { %280 = vmatprep.subr.bf16.mxu0 %v863_v1  ;;  %323 = vmatprep.subr.bf16.mxu1 %v865_v2  ;;  %v869_v5 = vld [vmem:[#allocation5 + $0x24] ss:$16 sps:$4 sm:$0xff]   ;;  %v871_v6 = vld [vmem:[#allocation5 + $0x2c] ss:$16 sps:$4 sm:$0xff]   ;;  %v873_v7 = vld [vmem:[#allocation5 + $0x20] ss:$16 sps:$4 sm:$0xff]  }
  0x3b   :  { %281 = vmatpush1.bf16.msra.mxu0 %v867_v3  ;;  %324 = vmatpush1.bf16.msra.mxu1 %v868_v4  ;;  %v874_v8 = vld [vmem:[#allocation5 + $0x28] ss:$16 sps:$4 sm:$0xff]   ;;  %v875_v9 = vld [vmem:[#allocation5 + $0x44] ss:$16 sps:$4 sm:$0xff]   ;;  %v877_v10 = vld [vmem:[#allocation5 + $0x4c] ss:$16 sps:$4 sm:$0xff]   ;;  %v100_v4 = vlaneseq }
  0x3c   :  { %282 = vmatprep.subr.bf16.mxu0 %v869_v5  ;;  %325 = vmatprep.subr.bf16.mxu1 %v871_v6  ;;  %v879_v11 = vld [vmem:[#allocation5 + $0x40] ss:$16 sps:$4 sm:$0xff]   ;;  %v880_v12 = vld [vmem:[#allocation5 + $0x48] ss:$16 sps:$4 sm:$0xff]   ;;  %v881_v13 = vld [vmem:[#allocation5 + $0x64] ss:$16 sps:$4 sm:$0xff]  }
  0x3d   :  { %v883_v14 = vld [vmem:[#allocation5 + $0x6c] ss:$16 sps:$4 sm:$0xff]   ;;  %v885_v15 = vld [vmem:[#allocation5 + $0x60] ss:$16 sps:$4 sm:$0xff]   ;;  %v886_v16 = vld [vmem:[#allocation5 + $0x68] ss:$16 sps:$4 sm:$0xff]  }
  0x3e   :  { %v887_v17 = vld [vmem:[#allocation5 + $0x84] ss:$16 sps:$4 sm:$0xff]   ;;  %v889_v18 = vld [vmem:[#allocation5 + $0x8c] ss:$16 sps:$4 sm:$0xff]   ;;  %v891_v19 = vld [vmem:[#allocation5 + $0x80] ss:$16 sps:$4 sm:$0xff]  }
  0x3f   :  { %283 = vmatpush1.bf16.msra.mxu0 %v873_v7  ;;  %326 = vmatpush1.bf16.msra.mxu1 %v874_v8  ;;  %v892_v20 = vld [vmem:[#allocation5 + $0x88] ss:$16 sps:$4 sm:$0xff]   ;;  %v893_v21 = vld [vmem:[#allocation5 + $0xa4] ss:$16 sps:$4 sm:$0xff]   ;;  %v895_v22 = vld [vmem:[#allocation5 + $0xac] ss:$16 sps:$4 sm:$0xff]  }
  0x40   :  { %284 = vmatprep.subr.bf16.mxu0 %v875_v9  ;;  %327 = vmatprep.subr.bf16.mxu1 %v877_v10  ;;  %v897_v23 = vld [vmem:[#allocation5 + $0xa0] ss:$16 sps:$4 sm:$0xff]   ;;  %v898_v24 = vld [vmem:[#allocation5 + $0xa8] ss:$16 sps:$4 sm:$0xff]   ;;  %v899_v25 = vld [vmem:[#allocation5 + $0xc4] ss:$16 sps:$4 sm:$0xff]  }
  0x41   :  { %v901_v26 = vld [vmem:[#allocation5 + $0xcc] ss:$16 sps:$4 sm:$0xff]   ;;  %v903_v27 = vld [vmem:[#allocation5 + $0xc0] ss:$16 sps:$4 sm:$0xff]   ;;  %v904_v28 = vld [vmem:[#allocation5 + $0xc8] ss:$16 sps:$4 sm:$0xff]  }
  0x42   :  { %v905_v29 = vld [vmem:[#allocation5 + $0xe4] ss:$16 sps:$4 sm:$0xff]   ;;  %v907_v30 = vld [vmem:[#allocation5 + $0xec] ss:$16 sps:$4 sm:$0xff]   ;;  %v909_v31 = vld [vmem:[#allocation5 + $0xe0] ss:$16 sps:$4 sm:$0xff]  }
  0x43   :  { %285 = vmatpush1.bf16.msra.mxu0 %v879_v11  ;;  %328 = vmatpush1.bf16.msra.mxu1 %v880_v12  ;;  %v910_v32 = vld [vmem:[#allocation5 + $0xe8] ss:$16 sps:$4 sm:$0xff]   ;;  %v63_v33 = vld [vmem:[#allocation2] sm:$0xff]  ;;  %v911_v35 = vld [vmem:[#allocation7 + $0x40] sm:$0xff]   ;;  %v101_v5 = vshrl.u32 %v100_v4, 7  ;;  %s1047_s10 = smov [#allocation8]  }
  0x44   :  { %286 = vmatprep.subr.bf16.mxu0 %v881_v13  ;;  %329 = vmatprep.subr.bf16.mxu1 %v883_v14  ;;  %v912_v36 = vld [vmem:[#allocation7 + $0xc0] sm:$0xff]   ;;  %v65_v38 = vpack.c.bf16 %v64_v34, %v63_v33  ;;  %v915_v40 = vld [vmem:[#allocation7 + $0x48] sm:$0xff]   ;;  %v919_v44 = vld [vmem:[#allocation7 + $0x50] sm:$0xff]   ;;  %s730_s11 = sshll.u32 %s1047_s10, 4  ;;  %s731_s11 = int_to_ptr.vmem [resolvable:$true] %s730_s11 }
  0x45   :  { %v913_v37 = vld [vmem:[#allocation7] sm:$0xff]   ;;  %v916_v41 = vld [vmem:[#allocation7 + $0xc8] sm:$0xff]   ;;  %v920_v45 = vld [vmem:[#allocation7 + $0xd0] sm:$0xff]   ;;  %v102_v6 = vsub.s32 0, %v101_v5  ;;  %v110_v7 = vsub.s32 2, %v101_v5  ;;  %v106_v9 = vsub.s32 1, %v101_v5  ;;  %p1014_p11 = scmp.lt.s32.totalorder %s731_s11, %s731_s11 }
  0x46   :  { %v914_v39 = vld [vmem:[#allocation7 + $0x80] sm:$0xff]   ;;  %v917_v42 = vld [vmem:[#allocation7 + $0x8] sm:$0xff]   ;;  %v921_v46 = vld [vmem:[#allocation7 + $0x10] sm:$0xff]   ;;  %v114_v10 = vsub.s32 3, %v101_v5 }
  0x47   :  { %287 = vmatpush1.bf16.msra.mxu0 %v885_v15  ;;  %330 = vmatpush1.bf16.msra.mxu1 %v886_v16  ;;  %v918_v43 = vld [vmem:[#allocation7 + $0x88] sm:$0xff]   ;;  %v922_v47 = vld [vmem:[#allocation7 + $0x90] sm:$0xff]   ;;  %v923_v48 = vld [vmem:[#allocation7 + $0x58] sm:$0xff]  }
  0x48   :  { %288 = vmatprep.subr.bf16.mxu0 %v887_v17  ;;  %331 = vmatprep.subr.bf16.mxu1 %v889_v18  ;;  %v924_v49 = vld [vmem:[#allocation7 + $0xd8] sm:$0xff]   ;;  %v927_v52 = vld [vmem:[#allocation7 + $0x60] sm:$0xff]   ;;  %v931_v56 = vld [vmem:[#allocation7 + $0x68] sm:$0xff]  }
  0x49   :  { %v925_v50 = vld [vmem:[#allocation7 + $0x18] sm:$0xff]   ;;  %v928_v53 = vld [vmem:[#allocation7 + $0xe0] sm:$0xff]   ;;  %v932_v57 = vld [vmem:[#allocation7 + $0xe8] sm:$0xff]  }
  0x4a   :  { %v926_v51 = vld [vmem:[#allocation7 + $0x98] sm:$0xff]   ;;  %v929_v54 = vld [vmem:[#allocation7 + $0x20] sm:$0xff]   ;;  %v933_v58 = vld [vmem:[#allocation7 + $0x28] sm:$0xff]  }
  0x4b   :  { %289 = vmatpush1.bf16.msra.mxu0 %v891_v19  ;;  %332 = vmatpush1.bf16.msra.mxu1 %v892_v20  ;;  %v930_v55 = vld [vmem:[#allocation7 + $0xa0] sm:$0xff]   ;;  %v934_v59 = vld [vmem:[#allocation7 + $0xa8] sm:$0xff]   ;;  %v935_v60 = vld [vmem:[#allocation7 + $0x70] sm:$0xff]  }
  0x4c   :  { %290 = vmatprep.subr.bf16.mxu0 %v893_v21  ;;  %333 = vmatprep.subr.bf16.mxu1 %v895_v22  ;;  %v936_v61 = vld [vmem:[#allocation7 + $0xf0] sm:$0xff]   ;;  %v939_v0 = vld [vmem:[#allocation7 + $0x78] sm:$0xff]  }
  0x4d   :  { %v937_v62 = vld [vmem:[#allocation7 + $0x30] sm:$0xff]   ;;  %v940_v1 = vld [vmem:[#allocation7 + $0xf8] sm:$0xff]  }
  0x4e   :  { %v938_v63 = vld [vmem:[#allocation7 + $0xb0] sm:$0xff]   ;;  %v941_v2 = vld [vmem:[#allocation7 + $0x38] sm:$0xff]  }
  0x4f   :  { %291 = vmatpush1.bf16.msra.mxu0 %v897_v23  ;;  %334 = vmatpush1.bf16.msra.mxu1 %v898_v24  ;;  %v942_v3 = vld [vmem:[#allocation7 + $0xb8] sm:$0xff]   ;;  %v98_v8 = vld [vmem:[%s1140_s2] sm:$0xf] }
  0x50   :  { %292 = vmatprep.subr.bf16.mxu0 %v899_v25  ;;  %335 = vmatprep.subr.bf16.mxu1 %v901_v26  ;;  %v103_v11 = vrot.slane %v98_v8, %v102_v6  ;;  %v111_v12 = vrot.slane %v98_v8, %v110_v7  ;;  %v107_v13 = vrot.slane %v98_v8, %v106_v9 }
  0x51   :  { %v115_v14 = vrot.slane %v98_v8, %v114_v10 }
  0x53   :  { %293 = vmatpush1.bf16.msra.mxu0 %v903_v27  ;;  %336 = vmatpush1.bf16.msra.mxu1 %v904_v28 }
  0x54   :  { %294 = vmatprep.subr.bf16.mxu0 %v905_v29  ;;  %337 = vmatprep.subr.bf16.mxu1 %v907_v30 }
  0x57   :  { %295 = vmatpush1.bf16.msra.mxu0 %v909_v31  ;;  %338 = vmatpush1.bf16.msra.mxu1 %v910_v32 }
  0x58   :  { %808 = vmatprep.subr.bf16.mxu0 %v911_v35  ;;  %830 = vmatprep.subr.bf16.mxu1 %v912_v36 }
  0x5a   :  { %313 = vmatmul.mubr.bf16.vlgmr.msra.gmra.mrb[0].mxu0 %v65_v38  ;;  %356 = vmatmul.mubr.bf16.vlgmr.msra.gmra.mrb[0].mxu1 %v65_v38 }
  0x5b   :  { %809 = vmatpush3.bf16.msra.mxu0 %v913_v37  ;;  %831 = vmatpush3.bf16.msra.mxu1 %v914_v39 }
  0x5c   :  { %810 = vmatprep.subr.bf16.mxu0 %v915_v40  ;;  %832 = vmatprep.subr.bf16.mxu1 %v916_v41 }
  0x5f   :  { %811 = vmatpush3.bf16.msra.mxu0 %v917_v42  ;;  %833 = vmatpush3.bf16.msra.mxu1 %v918_v43 }
  0x60   :  { %812 = vmatprep.subr.bf16.mxu0 %v919_v44  ;;  %834 = vmatprep.subr.bf16.mxu1 %v920_v45  ;;  %v775_v45 = vld [vmem:[%s1142_s4] ss:$0 sm:$0xff]  ;;  %s1009_s4 = scalar_lea.vmem %s731_s11, 256 }
  0x61   :  { %p1010_p10 = scmp.ne.s32.totalorder %s731_s11, %s1009_s4  ;;  %p1015_p12 = scmp.lt.s32.totalorder %s1009_s4, %s1009_s4 }
  0x63   :  { %813 = vmatpush3.bf16.msra.mxu0 %v921_v46  ;;  %835 = vmatpush3.bf16.msra.mxu1 %v922_v47  ;;  %p1016_p13 = por %p1015_p12, %p1014_p11 }
  0x64   :  { %814 = vmatprep.subr.bf16.mxu0 %v923_v48  ;;  %836 = vmatprep.subr.bf16.mxu1 %v924_v49 }
  0x65   :  { %p1017_p0 = pnand %p1016_p13, %p1010_p10 }
  0x67   :  { %815 = vmatpush3.bf16.msra.mxu0 %v925_v50  ;;  %837 = vmatpush3.bf16.msra.mxu1 %v926_v51 }
  0x68   :  { %816 = vmatprep.subr.bf16.mxu0 %v927_v52  ;;  %838 = vmatprep.subr.bf16.mxu1 %v928_v53 }
  0x6b   :  { %817 = vmatpush3.bf16.msra.mxu0 %v929_v54  ;;  %839 = vmatpush3.bf16.msra.mxu1 %v930_v55 }
  0x6c   :  { %818 = vmatprep.subr.bf16.mxu0 %v931_v56  ;;  %840 = vmatprep.subr.bf16.mxu1 %v932_v57 }
  0x6f   :  { %819 = vmatpush3.bf16.msra.mxu0 %v933_v58  ;;  %841 = vmatpush3.bf16.msra.mxu1 %v934_v59 }
  0x70   :  { %820 = vmatprep.subr.bf16.mxu0 %v935_v60  ;;  %842 = vmatprep.subr.bf16.mxu1 %v936_v61 }
  0x73   :  { %821 = vmatpush3.bf16.msra.mxu0 %v937_v62  ;;  %843 = vmatpush3.bf16.msra.mxu1 %v938_v63 }
  0x74   :  { %822 = vmatprep.subr.bf16.mxu0 %v939_v0  ;;  %844 = vmatprep.subr.bf16.mxu1 %v940_v1 }
  0x77   :  { %823 = vmatpush3.bf16.msra.mxu0 %v941_v2  ;;  %845 = vmatpush3.bf16.msra.mxu1 %v942_v3 }
 0x12d   :  { %v314_v15 = vpop.f32.mrb[0].mxu0  ;;  %v357_v16 = vpop.f32.mrb[0].mxu1 }
 0x12e   :  { %v315_v17 = vadd.f32 %v314_v15, %v103_v11  ;;  %v358_v18 = vadd.f32 %v357_v16, %v111_v12  ;;  %v316_v19 = vpop.f32.mrb[1].mxu0  ;;  %v359_v20 = vpop.f32.mrb[1].mxu1 }
 0x12f   :  { %v317_v21 = vadd.f32 %v316_v19, %v107_v13  ;;  %v360_v22 = vadd.f32 %v359_v20, %v115_v14  ;;  %v318_v23 = vpop.f32.mrb[2].mxu0  ;;  %v361_v24 = vpop.f32.mrb[2].mxu1 }
 0x130   :  { %v368_v25 = vmax.f32 %v358_v18, 0.0  ;;  %v319_v26 = vadd.f32 %v318_v23, %v103_v11  ;;  %v362_v27 = vadd.f32 %v361_v24, %v111_v12  ;;  %v320_v28 = vpop.f32.mrb[3].mxu0  ;;  %v363_v29 = vpop.f32.mrb[3].mxu1  ;;  %v366_v33 = vmax.f32 %v315_v17, 0.0 }
 0x131   :  { %v369_v30 = vmax.f32 %v360_v22, 0.0  ;;  %v321_v31 = vadd.f32 %v320_v28, %v107_v13  ;;  %v364_v32 = vadd.f32 %v363_v29, %v115_v14  ;;  %v367_v36 = vmax.f32 %v317_v21, 0.0 }
 0x132   :  { %v370_v34 = vmax.f32 %v319_v26, 0.0  ;;  %v372_v35 = vmax.f32 %v362_v27, 0.0 }
 0x133   :  { %v371_v37 = vmax.f32 %v321_v31, 0.0  ;;  %v373_v38 = vmax.f32 %v364_v32, 0.0 }
 0x134   :  { %v374_v39 = vpack.c.bf16 %v370_v34, %v366_v33  ;;  %v376_v40 = vpack.c.bf16 %v372_v35, %v368_v25 }
 0x135   :  { %v375_v41 = vpack.c.bf16 %v371_v37, %v367_v36  ;;  %v377_v42 = vpack.c.bf16 %v373_v38, %v369_v30 }
 0x137   :  { %673 = vmatprep.mubr.bf16.mxu0 %v375_v41  ;;  %714 = vmatprep.mubr.bf16.mxu1 %v377_v42 }
 0x138   :  { %674 = vmatmul.mubr.bf16.vlgmr.msra.gmra.mrb[4].mxu0 %v374_v39  ;;  %715 = vmatmul.mubr.bf16.vlgmr.msra.gmra.mrb[4].mxu1 %v376_v40 }
 0x20b   :  { %v824_v43 = vpop.f32.mrb[4].mxu0  ;;  %v846_v44 = vpop.f32.mrb[4].mxu1 }
 0x20c   :  { %v825_v46 = vpop.f32.mrb[5].mxu0  ;;  %v847_v47 = vpop.f32.mrb[5].mxu1 }
 0x20d   :  { %v826_v48 = vadd.f32 %v825_v46, %v824_v43  ;;  %v848_v49 = vadd.f32 %v847_v47, %v846_v44  ;;  %v827_v50 = vpop.f32.mrb[6].mxu0  ;;  %v849_v51 = vpop.f32.mrb[6].mxu1 }
 0x20e   :  { %v828_v52 = vpop.f32.mrb[7].mxu0  ;;  %v850_v53 = vpop.f32.mrb[7].mxu1 }
 0x20f   :  { %v676_v54 = vadd.f32 %v826_v48, %v775_v45  ;;  %v829_v55 = vadd.f32 %v828_v52, %v827_v50  ;;  %v851_v56 = vadd.f32 %v850_v53, %v849_v51 }
 0x211   :  { %v717_v57 = vadd.f32 %v848_v49, %v676_v54  ;;  %v679_v58 = vadd.f32 %v829_v55, %v775_v45 }
 0x213   :  { %723 = vst [vmem:[#allocation8] sm:$0xff] %v717_v57  ;;  %v720_v59 = vadd.f32 %v851_v56, %v679_v58 }
 0x215   :  { %724 = vst [vmem:[#allocation8 + $0x8] sm:$0xff] %v720_v59 }
 0x216   :  { %1020 = shalt.err (!%p1017_p0)
}
 0x217   :  { %s1021_s14 = scalar_lea.hbm %s1143_s5, 256 }
 0x218   :  { %p1022_p1 = scmp.ne.s32.totalorder %s1143_s5, %s1021_s14  ;;  %p1025_p2 = scmp.lt.u32.totalorder %s1021_s14, %s1143_s5 }
 0x21a   :  { %p1027_p3 = pnand %p1025_p2, %p1022_p1 }
 0x21c   :  { %1030 = shalt.err (!%p1027_p3)
}
 0x21d   :  { %736 = dma.vmem_to_hbm [thread:$0]  %s731_s11, 256, %s1143_s5, [#allocation4], %s1041_s1, %s1041_s1, %s1042_s17  }
 0x21e   :  { %1035 = dma.done.wait [#allocation4], 256  }
 0x21f   :  { %1036 = vsyncadd [#allocation4], 4294967040 }
 0x220   :  { %740 = vsyncpa [#allocation3], 1 }
 0x221   :  { %741 = vsyncpa [#allocation6], 1 }
 0x222   :  { %742 = vsyncpa [#allocation4], 1 }

// kernel: tpu_custom_call.1
= control target key start
LH: loop header
LB: loop body
LE: loop exit
PB: predicated region body
PF: predicated region fallthrough
CT: control target
= control target key end

     0   :  { %10 = vsyncpa [#allocation3], 0  ;;  %s1138_s0 = inlined_call_operand.hbm [shape: f32[16,128], index: 0, kind: input, shape index: {}]   ;;  %s1139_s1 = inlined_call_operand.hbm [shape: bf16[128,512], index: 1, kind: input, shape index: {}]   ;;  %s1140_s2 = inlined_call_operand.vmem [shape: f32[1,512], index: 2, kind: input, shape index: {}]   ;;  %s1141_s3 = inlined_call_operand.hbm [shape: bf16[512,128], index: 3, kind: input, shape index: {}]   ;;  %s1142_s4 = inlined_call_operand.vmem [shape: f32[1,128], index: 4, kind: input, shape index: {}]   ;;  %s1143_s5 = inlined_call_operand.hbm [shape: f32[16,128], index: 5, kind: output, shape index: {}]  }
   0x1   :  { %11 = vsyncpa [#allocation6], 0 }
   0x2   :  { %12 = vsyncpa [#allocation4], 0  ;;  %s1037_s18 = smov [#allocation5]   ;;  %s943_s22 = scalar_lea.hbm %s1139_s1, 4096 }
   0x3   :  { %s30_s19 = sshll.u32 %s1037_s18, 4  ;;  %p944_p0 = scmp.ne.s32.totalorder %s1139_s1, %s943_s22  ;;  %s31_s19 = int_to_ptr.vmem [resolvable:$true] %s30_s19 }
   0x4   :  { %p947_p1 = scmp.lt.u32.totalorder %s943_s22, %s1139_s1 }
   0x6   :  { %p949_p2 = pnand %p947_p1, %p944_p0 }
   0x8   :  { %952 = shalt.err (!%p949_p2)
}
   0x9   :  { %s953_s27 = scalar_lea.vmem %s31_s19, 4096  ;;  %p958_p4 = scmp.lt.s32.totalorder %s31_s19, %s31_s19 }
   0xa   :  { %p954_p3 = scmp.ne.s32.totalorder %s31_s19, %s953_s27  ;;  %p959_p5 = scmp.lt.s32.totalorder %s953_s27, %s953_s27 }
   0xc   :  { %p960_p6 = por %p959_p5, %p958_p4 }
   0xe   :  { %p961_p7 = pnand %p960_p6, %p954_p3 }
  0x10   :  { %964 = shalt.err (!%p961_p7)
}
  0x11   :  { %s1038_s28 = smov 256   ;;  %s1039_s29 = smov 16  }
  0x12   :  { %36 = dma.hbm_to_vmem [thread:$0]  %s1139_s1, 4096, %s31_s19, [#allocation6], %s1038_s28, %s1038_s28, %s1039_s29  }
  0x13   :  { %s1040_s7 = smov [#allocation2]   ;;  %s965_s11 = scalar_lea.hbm %s1138_s0, 256 }
  0x14   :  { %s18_s8 = sshll.u32 %s1040_s7, 4  ;;  %p966_p8 = scmp.ne.s32.totalorder %s1138_s0, %s965_s11  ;;  %s19_s8 = int_to_ptr.vmem [resolvable:$true] %s18_s8 }
  0x15   :  { %p969_p9 = scmp.lt.u32.totalorder %s965_s11, %s1138_s0 }
  0x17   :  { %p971_p10 = pnand %p969_p9, %p966_p8 }
  0x19   :  { %974 = shalt.err (!%p971_p10)
}
  0x1a   :  { %s975_s16 = scalar_lea.vmem %s19_s8, 256  ;;  %p980_p12 = scmp.lt.s32.totalorder %s19_s8, %s19_s8 }
  0x1b   :  { %p976_p11 = scmp.ne.s32.totalorder %s19_s8, %s975_s16  ;;  %p981_p13 = scmp.lt.s32.totalorder %s975_s16, %s975_s16 }
  0x1d   :  { %p982_p0 = por %p981_p13, %p980_p12 }
  0x1f   :  { %p983_p1 = pnand %p982_p0, %p976_p11 }
  0x21   :  { %986 = shalt.err (!%p983_p1)
}
  0x22   :  { %s1041_s1 = smov 128   ;;  %s1042_s17 = smov 8  }
  0x23   :  { %24 = dma.hbm_to_vmem [thread:$0]  %s1138_s0, 256, %s19_s8, [#allocation3], %s1041_s1, %s1041_s1, %s1042_s17  }
  0x24   :  { %s1043_s20 = smov [#allocation7]   ;;  %s987_s24 = scalar_lea.hbm %s1141_s3, 4096 }
  0x25   :  { %s44_s21 = sshll.u32 %s1043_s20, 4  ;;  %p988_p2 = scmp.ne.s32.totalorder %s1141_s3, %s987_s24  ;;  %s45_s21 = int_to_ptr.vmem [resolvable:$true] %s44_s21 }
  0x26   :  { %p991_p3 = scmp.lt.u32.totalorder %s987_s24, %s1141_s3 }
  0x28   :  { %p993_p4 = pnand %p991_p3, %p988_p2 }
  0x2a   :  { %996 = shalt.err (!%p993_p4)
}
  0x2b   :  { %s997_s29 = scalar_lea.vmem %s45_s21, 4096  ;;  %p1002_p6 = scmp.lt.s32.totalorder %s45_s21, %s45_s21 }
  0x2c   :  { %p998_p5 = scmp.ne.s32.totalorder %s45_s21, %s997_s29  ;;  %p1003_p7 = scmp.lt.s32.totalorder %s997_s29, %s997_s29 }
  0x2e   :  { %p1004_p8 = por %p1003_p7, %p1002_p6 }
  0x30   :  { %p1005_p9 = pnand %p1004_p8, %p998_p5 }
  0x32   :  { %1008 = shalt.err (!%p1005_p9)
}
  0x33   :  { %s1044_s0 = smov 64   ;;  %s1045_s30 = smov 4  }
  0x34   :  { %50 = dma.hbm_to_vmem [thread:$0]  %s1141_s3, 4096, %s45_s21, [#allocation6], %s1044_s0, %s1044_s0, %s1045_s30  }
  0x35   :  { %1031 = dma.done.wait [#allocation3], 256  }
  0x36   :  { %1032 = vsyncadd [#allocation3], 4294967040 }
  0x37   :  { %1033 = dma.done.wait [#allocation6], 8192  }
  0x38   :  { %1034 = vsyncadd [#allocation6], 4294959104  ;;  %v1046_v0 = vmov 0   ;;  %v863_v1 = vld [vmem:[#allocation5 + $0x4] ss:$16 sps:$4 sm:$0xff]   ;;  %v64_v34 = vld [vmem:[#allocation2 + $0x8] sm:$0xff] }
  0x39   :  { %312 = vmatprep.mubr.bf16.mxu0 %v1046_v0  ;;  %355 = vmatprep.mubr.bf16.mxu1 %v1046_v0  ;;  %v865_v2 = vld [vmem:[#allocation5 + $0xc] ss:$16 sps:$4 sm:$0xff]   ;;  %v867_v3 = vld [vmem:[#allocation5] ss:$16 sps:$4 sm:$0xff]   ;;  %v868_v4 = vld [vmem:[#allocation5 + $0x8] ss:$16 sps:$4 sm:$0xff]  }
  0x3a   :  { %280 = vmatprep.subr.bf16.mxu0 %v863_v1  ;;  %323 = vmatprep.subr.bf16.mxu1 %v865_v2  ;;  %v869_v5 = vld [vmem:[#allocation5 + $0x24] ss:$16 sps:$4 sm:$0xff]   ;;  %v871_v6 = vld [vmem:[#allocation5 + $0x2c] ss:$16 sps:$4 sm:$0xff]   ;;  %v873_v7 = vld [vmem:[#allocation5 + $0x20] ss:$16 sps:$4 sm:$0xff]  }
  0x3b   :  { %281 = vmatpush1.bf16.msra.mxu0 %v867_v3  ;;  %324 = vmatpush1.bf16.msra.mxu1 %v868_v4  ;;  %v874_v8 = vld [vmem:[#allocation5 + $0x28] ss:$16 sps:$4 sm:$0xff]   ;;  %v875_v9 = vld [vmem:[#allocation5 + $0x44] ss:$16 sps:$4 sm:$0xff]   ;;  %v877_v10 = vld [vmem:[#allocation5 + $0x4c] ss:$16 sps:$4 sm:$0xff]   ;;  %v100_v4 = vlaneseq }
  0x3c   :  { %282 = vmatprep.subr.bf16.mxu0 %v869_v5  ;;  %325 = vmatprep.subr.bf16.mxu1 %v871_v6  ;;  %v879_v11 = vld [vmem:[#allocation5 + $0x40] ss:$16 sps:$4 sm:$0xff]   ;;  %v880_v12 = vld [vmem:[#allocation5 + $0x48] ss:$16 sps:$4 sm:$0xff]   ;;  %v881_v13 = vld [vmem:[#allocation5 + $0x64] ss:$16 sps:$4 sm:$0xff]  }
  0x3d   :  { %v883_v14 = vld [vmem:[#allocation5 + $0x6c] ss:$16 sps:$4 sm:$0xff]   ;;  %v885_v15 = vld [vmem:[#allocation5 + $0x60] ss:$16 sps:$4 sm:$0xff]   ;;  %v886_v16 = vld [vmem:[#allocation5 + $0x68] ss:$16 sps:$4 sm:$0xff]  }
  0x3e   :  { %v887_v17 = vld [vmem:[#allocation5 + $0x84] ss:$16 sps:$4 sm:$0xff]   ;;  %v889_v18 = vld [vmem:[#allocation5 + $0x8c] ss:$16 sps:$4 sm:$0xff]   ;;  %v891_v19 = vld [vmem:[#allocation5 + $0x80] ss:$16 sps:$4 sm:$0xff]  }
  0x3f   :  { %283 = vmatpush1.bf16.msra.mxu0 %v873_v7  ;;  %326 = vmatpush1.bf16.msra.mxu1 %v874_v8  ;;  %v892_v20 = vld [vmem:[#allocation5 + $0x88] ss:$16 sps:$4 sm:$0xff]   ;;  %v893_v21 = vld [vmem:[#allocation5 + $0xa4] ss:$16 sps:$4 sm:$0xff]   ;;  %v895_v22 = vld [vmem:[#allocation5 + $0xac] ss:$16 sps:$4 sm:$0xff]  }
  0x40   :  { %284 = vmatprep.subr.bf16.mxu0 %v875_v9  ;;  %327 = vmatprep.subr.bf16.mxu1 %v877_v10  ;;  %v897_v23 = vld [vmem:[#allocation5 + $0xa0] ss:$16 sps:$4 sm:$0xff]   ;;  %v898_v24 = vld [vmem:[#allocation5 + $0xa8] ss:$16 sps:$4 sm:$0xff]   ;;  %v899_v25 = vld [vmem:[#allocation5 + $0xc4] ss:$16 sps:$4 sm:$0xff]  }
  0x41   :  { %v901_v26 = vld [vmem:[#allocation5 + $0xcc] ss:$16 sps:$4 sm:$0xff]   ;;  %v903_v27 = vld [vmem:[#allocation5 + $0xc0] ss:$16 sps:$4 sm:$0xff]   ;;  %v904_v28 = vld [vmem:[#allocation5 + $0xc8] ss:$16 sps:$4 sm:$0xff]  }
  0x42   :  { %v905_v29 = vld [vmem:[#allocation5 + $0xe4] ss:$16 sps:$4 sm:$0xff]   ;;  %v907_v30 = vld [vmem:[#allocation5 + $0xec] ss:$16 sps:$4 sm:$0xff]   ;;  %v909_v31 = vld [vmem:[#allocation5 + $0xe0] ss:$16 sps:$4 sm:$0xff]  }
  0x43   :  { %285 = vmatpush1.bf16.msra.mxu0 %v879_v11  ;;  %328 = vmatpush1.bf16.msra.mxu1 %v880_v12  ;;  %v910_v32 = vld [vmem:[#allocation5 + $0xe8] ss:$16 sps:$4 sm:$0xff]   ;;  %v63_v33 = vld [vmem:[#allocation2] sm:$0xff]  ;;  %v911_v35 = vld [vmem:[#allocation7 + $0x40] sm:$0xff]   ;;  %v101_v5 = vshrl.u32 %v100_v4, 7  ;;  %s1047_s10 = smov [#allocation8]  }
  0x44   :  { %286 = vmatprep.subr.bf16.mxu0 %v881_v13  ;;  %329 = vmatprep.subr.bf16.mxu1 %v883_v14  ;;  %v912_v36 = vld [vmem:[#allocation7 + $0xc0] sm:$0xff]   ;;  %v65_v38 = vpack.c.bf16 %v64_v34, %v63_v33  ;;  %v915_v40 = vld [vmem:[#allocation7 + $0x48] sm:$0xff]   ;;  %v919_v44 = vld [vmem:[#allocation7 + $0x50] sm:$0xff]   ;;  %s730_s11 = sshll.u32 %s1047_s10, 4  ;;  %s731_s11 = int_to_ptr.vmem [resolvable:$true] %s730_s11 }
  0x45   :  { %v913_v37 = vld [vmem:[#allocation7] sm:$0xff]   ;;  %v916_v41 = vld [vmem:[#allocation7 + $0xc8] sm:$0xff]   ;;  %v920_v45 = vld [vmem:[#allocation7 + $0xd0] sm:$0xff]   ;;  %v102_v6 = vsub.s32 0, %v101_v5  ;;  %v110_v7 = vsub.s32 2, %v101_v5  ;;  %v106_v9 = vsub.s32 1, %v101_v5  ;;  %p1014_p11 = scmp.lt.s32.totalorder %s731_s11, %s731_s11 }
  0x46   :  { %v914_v39 = vld [vmem:[#allocation7 + $0x80] sm:$0xff]   ;;  %v917_v42 = vld [vmem:[#allocation7 + $0x8] sm:$0xff]   ;;  %v921_v46 = vld [vmem:[#allocation7 + $0x10] sm:$0xff]   ;;  %v114_v10 = vsub.s32 3, %v101_v5 }
  0x47   :  { %287 = vmatpush1.bf16.msra.mxu0 %v885_v15  ;;  %330 = vmatpush1.bf16.msra.mxu1 %v886_v16  ;;  %v918_v43 = vld [vmem:[#allocation7 + $0x88] sm:$0xff]   ;;  %v922_v47 = vld [vmem:[#allocation7 + $0x90] sm:$0xff]   ;;  %v923_v48 = vld [vmem:[#allocation7 + $0x58] sm:$0xff]  }
  0x48   :  { %288 = vmatprep.subr.bf16.mxu0 %v887_v17  ;;  %331 = vmatprep.subr.bf16.mxu1 %v889_v18  ;;  %v924_v49 = vld [vmem:[#allocation7 + $0xd8] sm:$0xff]   ;;  %v927_v52 = vld [vmem:[#allocation7 + $0x60] sm:$0xff]   ;;  %v931_v56 = vld [vmem:[#allocation7 + $0x68] sm:$0xff]  }
  0x49   :  { %v925_v50 = vld [vmem:[#allocation7 + $0x18] sm:$0xff]   ;;  %v928_v53 = vld [vmem:[#allocation7 + $0xe0] sm:$0xff]   ;;  %v932_v57 = vld [vmem:[#allocation7 + $0xe8] sm:$0xff]  }
  0x4a   :  { %v926_v51 = vld [vmem:[#allocation7 + $0x98] sm:$0xff]   ;;  %v929_v54 = vld [vmem:[#allocation7 + $0x20] sm:$0xff]   ;;  %v933_v58 = vld [vmem:[#allocation7 + $0x28] sm:$0xff]  }
  0x4b   :  { %289 = vmatpush1.bf16.msra.mxu0 %v891_v19  ;;  %332 = vmatpush1.bf16.msra.mxu1 %v892_v20  ;;  %v930_v55 = vld [vmem:[#allocation7 + $0xa0] sm:$0xff]   ;;  %v934_v59 = vld [vmem:[#allocation7 + $0xa8] sm:$0xff]   ;;  %v935_v60 = vld [vmem:[#allocation7 + $0x70] sm:$0xff]  }
  0x4c   :  { %290 = vmatprep.subr.bf16.mxu0 %v893_v21  ;;  %333 = vmatprep.subr.bf16.mxu1 %v895_v22  ;;  %v936_v61 = vld [vmem:[#allocation7 + $0xf0] sm:$0xff]   ;;  %v939_v0 = vld [vmem:[#allocation7 + $0x78] sm:$0xff]  }
  0x4d   :  { %v937_v62 = vld [vmem:[#allocation7 + $0x30] sm:$0xff]   ;;  %v940_v1 = vld [vmem:[#allocation7 + $0xf8] sm:$0xff]  }
  0x4e   :  { %v938_v63 = vld [vmem:[#allocation7 + $0xb0] sm:$0xff]   ;;  %v941_v2 = vld [vmem:[#allocation7 + $0x38] sm:$0xff]  }
  0x4f   :  { %291 = vmatpush1.bf16.msra.mxu0 %v897_v23  ;;  %334 = vmatpush1.bf16.msra.mxu1 %v898_v24  ;;  %v942_v3 = vld [vmem:[#allocation7 + $0xb8] sm:$0xff]   ;;  %v98_v8 = vld [vmem:[%s1140_s2] sm:$0xf] }
  0x50   :  { %292 = vmatprep.subr.bf16.mxu0 %v899_v25  ;;  %335 = vmatprep.subr.bf16.mxu1 %v901_v26  ;;  %v103_v11 = vrot.slane %v98_v8, %v102_v6  ;;  %v111_v12 = vrot.slane %v98_v8, %v110_v7  ;;  %v107_v13 = vrot.slane %v98_v8, %v106_v9 }
  0x51   :  { %v115_v14 = vrot.slane %v98_v8, %v114_v10 }
  0x53   :  { %293 = vmatpush1.bf16.msra.mxu0 %v903_v27  ;;  %336 = vmatpush1.bf16.msra.mxu1 %v904_v28 }
  0x54   :  { %294 = vmatprep.subr.bf16.mxu0 %v905_v29  ;;  %337 = vmatprep.subr.bf16.mxu1 %v907_v30 }
  0x57   :  { %295 = vmatpush1.bf16.msra.mxu0 %v909_v31  ;;  %338 = vmatpush1.bf16.msra.mxu1 %v910_v32 }
  0x58   :  { %808 = vmatprep.subr.bf16.mxu0 %v911_v35  ;;  %830 = vmatprep.subr.bf16.mxu1 %v912_v36 }
  0x5a   :  { %313 = vmatmul.mubr.bf16.vlgmr.msra.gmra.mrb[0].mxu0 %v65_v38  ;;  %356 = vmatmul.mubr.bf16.vlgmr.msra.gmra.mrb[0].mxu1 %v65_v38 }
  0x5b   :  { %809 = vmatpush3.bf16.msra.mxu0 %v913_v37  ;;  %831 = vmatpush3.bf16.msra.mxu1 %v914_v39 }
  0x5c   :  { %810 = vmatprep.subr.bf16.mxu0 %v915_v40  ;;  %832 = vmatprep.subr.bf16.mxu1 %v916_v41 }
  0x5f   :  { %811 = vmatpush3.bf16.msra.mxu0 %v917_v42  ;;  %833 = vmatpush3.bf16.msra.mxu1 %v918_v43 }
  0x60   :  { %812 = vmatprep.subr.bf16.mxu0 %v919_v44  ;;  %834 = vmatprep.subr.bf16.mxu1 %v920_v45  ;;  %v775_v45 = vld [vmem:[%s1142_s4] ss:$0 sm:$0xff]  ;;  %s1009_s4 = scalar_lea.vmem %s731_s11, 256 }
  0x61   :  { %p1010_p10 = scmp.ne.s32.totalorder %s731_s11, %s1009_s4  ;;  %p1015_p12 = scmp.lt.s32.totalorder %s1009_s4, %s1009_s4 }
  0x63   :  { %813 = vmatpush3.bf16.msra.mxu0 %v921_v46  ;;  %835 = vmatpush3.bf16.msra.mxu1 %v922_v47  ;;  %p1016_p13 = por %p1015_p12, %p1014_p11 }
  0x64   :  { %814 = vmatprep.subr.bf16.mxu0 %v923_v48  ;;  %836 = vmatprep.subr.bf16.mxu1 %v924_v49 }
  0x65   :  { %p1017_p0 = pnand %p1016_p13, %p1010_p10 }
  0x67   :  { %815 = vmatpush3.bf16.msra.mxu0 %v925_v50  ;;  %837 = vmatpush3.bf16.msra.mxu1 %v926_v51 }
  0x68   :  { %816 = vmatprep.subr.bf16.mxu0 %v927_v52  ;;  %838 = vmatprep.subr.bf16.mxu1 %v928_v53 }
  0x6b   :  { %817 = vmatpush3.bf16.msra.mxu0 %v929_v54  ;;  %839 = vmatpush3.bf16.msra.mxu1 %v930_v55 }
  0x6c   :  { %818 = vmatprep.subr.bf16.mxu0 %v931_v56  ;;  %840 = vmatprep.subr.bf16.mxu1 %v932_v57 }
  0x6f   :  { %819 = vmatpush3.bf16.msra.mxu0 %v933_v58  ;;  %841 = vmatpush3.bf16.msra.mxu1 %v934_v59 }
  0x70   :  { %820 = vmatprep.subr.bf16.mxu0 %v935_v60  ;;  %842 = vmatprep.subr.bf16.mxu1 %v936_v61 }
  0x73   :  { %821 = vmatpush3.bf16.msra.mxu0 %v937_v62  ;;  %843 = vmatpush3.bf16.msra.mxu1 %v938_v63 }
  0x74   :  { %822 = vmatprep.subr.bf16.mxu0 %v939_v0  ;;  %844 = vmatprep.subr.bf16.mxu1 %v940_v1 }
  0x77   :  { %823 = vmatpush3.bf16.msra.mxu0 %v941_v2  ;;  %845 = vmatpush3.bf16.msra.mxu1 %v942_v3 }
 0x12d   :  { %v314_v15 = vpop.f32.mrb[0].mxu0  ;;  %v357_v16 = vpop.f32.mrb[0].mxu1 }
 0x12e   :  { %v315_v17 = vadd.f32 %v314_v15, %v103_v11  ;;  %v358_v18 = vadd.f32 %v357_v16, %v111_v12  ;;  %v316_v19 = vpop.f32.mrb[1].mxu0  ;;  %v359_v20 = vpop.f32.mrb[1].mxu1 }
 0x12f   :  { %v317_v21 = vadd.f32 %v316_v19, %v107_v13  ;;  %v360_v22 = vadd.f32 %v359_v20, %v115_v14  ;;  %v318_v23 = vpop.f32.mrb[2].mxu0  ;;  %v361_v24 = vpop.f32.mrb[2].mxu1 }
 0x130   :  { %v368_v25 = vmax.f32 %v358_v18, 0.0  ;;  %v319_v26 = vadd.f32 %v318_v23, %v103_v11  ;;  %v362_v27 = vadd.f32 %v361_v24, %v111_v12  ;;  %v320_v28 = vpop.f32.mrb[3].mxu0  ;;  %v363_v29 = vpop.f32.mrb[3].mxu1  ;;  %v366_v33 = vmax.f32 %v315_v17, 0.0 }
 0x131   :  { %v369_v30 = vmax.f32 %v360_v22, 0.0  ;;  %v321_v31 = vadd.f32 %v320_v28, %v107_v13  ;;  %v364_v32 = vadd.f32 %v363_v29, %v115_v14  ;;  %v367_v36 = vmax.f32 %v317_v21, 0.0 }
 0x132   :  { %v370_v34 = vmax.f32 %v319_v26, 0.0  ;;  %v372_v35 = vmax.f32 %v362_v27, 0.0 }
 0x133   :  { %v371_v37 = vmax.f32 %v321_v31, 0.0  ;;  %v373_v38 = vmax.f32 %v364_v32, 0.0 }
 0x134   :  { %v374_v39 = vpack.c.bf16 %v370_v34, %v366_v33  ;;  %v376_v40 = vpack.c.bf16 %v372_v35, %v368_v25 }
 0x135   :  { %v375_v41 = vpack.c.bf16 %v371_v37, %v367_v36  ;;  %v377_v42 = vpack.c.bf16 %v373_v38, %v369_v30 }
 0x137   :  { %673 = vmatprep.mubr.bf16.mxu0 %v375_v41  ;;  %714 = vmatprep.mubr.bf16.mxu1 %v377_v42 }
 0x138   :  { %674 = vmatmul.mubr.bf16.vlgmr.msra.gmra.mrb[4].mxu0 %v374_v39  ;;  %715 = vmatmul.mubr.bf16.vlgmr.msra.gmra.mrb[4].mxu1 %v376_v40 }
 0x20b   :  { %v824_v43 = vpop.f32.mrb[4].mxu0  ;;  %v846_v44 = vpop.f32.mrb[4].mxu1 }
 0x20c   :  { %v825_v46 = vpop.f32.mrb[5].mxu0  ;;  %v847_v47 = vpop.f32.mrb[5].mxu1 }
 0x20d   :  { %v826_v48 = vadd.f32 %v825_v46, %v824_v43  ;;  %v848_v49 = vadd.f32 %v847_v47, %v846_v44  ;;  %v827_v50 = vpop.f32.mrb[6].mxu0  ;;  %v849_v51 = vpop.f32.mrb[6].mxu1 }
 0x20e   :  { %v828_v52 = vpop.f32.mrb[7].mxu0  ;;  %v850_v53 = vpop.f32.mrb[7].mxu1 }
 0x20f   :  { %v676_v54 = vadd.f32 %v826_v48, %v775_v45  ;;  %v829_v55 = vadd.f32 %v828_v52, %v827_v50  ;;  %v851_v56 = vadd.f32 %v850_v53, %v849_v51 }
 0x211   :  { %v717_v57 = vadd.f32 %v848_v49, %v676_v54  ;;  %v679_v58 = vadd.f32 %v829_v55, %v775_v45 }
 0x213   :  { %723 = vst [vmem:[#allocation8] sm:$0xff] %v717_v57  ;;  %v720_v59 = vadd.f32 %v851_v56, %v679_v58 }
 0x215   :  { %724 = vst [vmem:[#allocation8 + $0x8] sm:$0xff] %v720_v59 }
 0x216   :  { %1020 = shalt.err (!%p1017_p0)
}
 0x217   :  { %s1021_s14 = scalar_lea.hbm %s1143_s5, 256 }
 0x218   :  { %p1022_p1 = scmp.ne.s32.totalorder %s1143_s5, %s1021_s14  ;;  %p1025_p2 = scmp.lt.u32.totalorder %s1021_s14, %s1143_s5 }
 0x21a   :  { %p1027_p3 = pnand %p1025_p2, %p1022_p1 }
 0x21c   :  { %1030 = shalt.err (!%p1027_p3)
}
 0x21d   :  { %736 = dma.vmem_to_hbm [thread:$0]  %s731_s11, 256, %s1143_s5, [#allocation4], %s1041_s1, %s1041_s1, %s1042_s17  }
 0x21e   :  { %1035 = dma.done.wait [#allocation4], 256  }
 0x21f   :  { %1036 = vsyncadd [#allocation4], 4294967040 }
 0x220   :  { %740 = vsyncpa [#allocation3], 1 }
 0x221   :  { %741 = vsyncpa [#allocation6], 1 }
 0x222   :  { %742 = vsyncpa [#allocation4], 1 }

</bundles_post_ra>
